<compile_context>
chip_gen: v5e
topology: v5e:2x2
jax: 0.10.0
libtpu: 0.0.40
codegen_flags: <defaults>
</compile_context>

<pallas_src>
import jax
import jax.numpy as jnp
from jax.experimental import pallas as pl
from jax.experimental.pallas import tpu as pltpu


def _murmur_mix32(elem_u32, key_u32):
    """Murmur3-style combine of a per-element u32 counter with a per-step u32 key -> mixed u32."""
    k = elem_u32 * jnp.uint32(0xCC9E2D51)
    k = (k << 15) | (k >> 17)                       # rotl 15
    k = k * jnp.uint32(0x1B873593)
    h = key_u32 ^ k
    h = ((h << 13) | (h >> 19)) * jnp.uint32(5) + jnp.uint32(0xE6546B64)
    # fmix32 finalizer (full avalanche)
    h = h ^ (h >> 16)
    h = h * jnp.uint32(0x85EBCA6B)
    h = h ^ (h >> 13)
    h = h * jnp.uint32(0xC2B2AE35)
    h = h ^ (h >> 16)
    return h


def _rate_encoder_kernel(seed_ref, params_ref, x_ref, out_ref):
    r = pl.program_id(0)                    # row-tile index
    tb = pl.program_id(1)                   # time-tile index
    t_tile, row_tile, lanes = out_ref.shape

    xmin = params_ref[0]                    # f32 scalar in SMEM
    scale = params_ref[1]                   # f32 scalar: 2^24 / (max - min)
    seed = seed_ref[0].astype(jnp.uint32)   # i32 scalar in SMEM

    # Integer spike threshold per element (in [0, 2^24]); computed once per input tile and
    # reused for all t_tile time steps of this grid iteration.
    thresh = ((x_ref[...] - xmin) * scale).astype(jnp.int32)

    # Globally unique per-element counter (unique across row tiles / lanes).
    row_ids = jax.lax.broadcasted_iota(jnp.int32, (row_tile, lanes), 0).astype(jnp.uint32)
    lane_ids = jax.lax.broadcasted_iota(jnp.int32, (row_tile, lanes), 1).astype(jnp.uint32)
    elem = (r.astype(jnp.uint32) * jnp.uint32(row_tile) + row_ids) * jnp.uint32(lanes) + lane_ids

    t_base = tb.astype(jnp.uint32) * jnp.uint32(t_tile)
    for ti in range(t_tile):                # static unroll; t_tile <= 8
        key = seed + (t_base + jnp.uint32(ti)) * jnp.uint32(0x9E3779B9)
        bits = _murmur_mix32(elem, key)
        u24 = (bits >> 8).astype(jnp.int32)                 # uniform 24-bit in [0, 2^24)
        out_ref[ti, :, :] = (u24 < thresh).astype(out_ref.dtype)   # Bernoulli(p) spike


def _pick_tile(total: int, max_tile: int, multiple: int = 1) -> int:
    """Largest tile <= max_tile dividing `total` (multiple-aligned), or `total` if it fits."""
    if total <= max_tile:
        return total
    for cand in range(max_tile, 0, -1):
        if total % cand == 0 and cand % multiple == 0:
            return cand
    return total


def rate_encode(x, T: int, seed: int = 0, out_dtype=jnp.float32,
                max_row_tile: int = 512, max_t_tile: int = 8):
    """Pallas implementation of RateEncoder(T).forward(x).

    x: float array (e.g. [B, C, H, W]).  Returns spikes of shape (T, *x.shape).
    out_dtype=float32 matches the torch module; pass jnp.bfloat16 (or int8 with a row tile
    that is a multiple of 32) to halve/quarter the HBM store traffic — 0/1 are exact in all.
    """
    orig_shape = tuple(x.shape)
    xf = x.astype(jnp.float32)

    # Hoisted global reduction (previously an in-kernel full-array reduction + VMEM scratch).
    xmin = jnp.min(xf)
    xmax = jnp.max(xf)
    rng = xmax - xmin
    safe_rng = jnp.where(rng > 0, rng, jnp.float32(1.0))   # guard constant input (torch would NaN)
    scale = jnp.float32(1 << 24) / safe_rng                 # p -> integer threshold p * 2^24
    params = jnp.stack([xmin, scale])                       # (2,) f32 scalars -> SMEM
    seed_arr = jnp.asarray([seed], dtype=jnp.int32)         # (1,) i32 scalar  -> SMEM

    LANES = 128
    SUBLANES = 8
    flat = xf.reshape(-1)
    n = flat.shape[0]
    pad = (-n) % (LANES * SUBLANES)
    if pad:
        # Pad to a whole number of (8, 128) tiles; padded spikes are sliced off below.
        flat = jnp.pad(flat, (0, pad))
    rows = flat.shape[0] // LANES
    x2 = flat.reshape(rows, LANES)

    row_tile = _pick_tile(rows, max_row_tile, multiple=8)   # second-to-last dim: mult of 8 / full
    t_tile = _pick_tile(T, max_t_tile, multiple=1)          # amortize per-grid-step overhead
    grid = (rows // row_tile, T // t_tile)                  # row axis outermost -> x tile DMA'd once

    out = pl.pallas_call(
        _rate_encoder_kernel,
        out_shape=jax.ShapeDtypeStruct((T, rows, LANES), out_dtype),
        grid=grid,
        in_specs=[
            pl.BlockSpec(memory_space=pltpu.MemorySpace.SMEM),       # seed
            pl.BlockSpec(memory_space=pltpu.MemorySpace.SMEM),       # [xmin, 2^24/range]
            pl.BlockSpec((row_tile, LANES), lambda r, t: (r, 0)),    # x tile (constant over t)
        ],
        out_specs=pl.BlockSpec((t_tile, row_tile, LANES), lambda r, t: (t, r, 0)),
        compiler_params=pltpu.CompilerParams(
            dimension_semantics=("parallel", "parallel"),            # no carry -> megacore-friendly
            vmem_limit_bytes=32 * 1024 * 1024,
        ),
    )(seed_arr, params, x2)

    spikes = out.reshape(T, rows * LANES)[:, :n].reshape((T,) + orig_shape)
    return spikes


if __name__ == "__main__":
    # Small shapes consistent with an NCHW image input.
    B, C, H, W = 2, 4, 16, 16
    T = 8
    key = jax.random.PRNGKey(0)
    x = jax.random.normal(key, (B, C, H, W), dtype=jnp.float32)

    spikes = rate_encode(x, T, seed=0)
    spikes = jax.block_until_ready(spikes)

    # Sanity checks: correct shape, binary values, mean spike rate close to mean probability.
    assert spikes.shape == (T, B, C, H, W)
    vals = jnp.unique(spikes)
    assert bool(jnp.all((vals == 0.0) | (vals == 1.0)))
    x_std = (x - x.min()) / (x.max() - x.min())
    assert abs(float(spikes.mean()) - float(x_std.mean())) < 0.05

    print("KERNEL_OK")
</pallas_src>

<mosaic_0001>
module attributes {stable_mosaic.version = 11 : i64} {
  func.func @_rate_encoder_kernel(%arg0: i32, %arg1: i32, %arg2: memref<1xi32, #tpu.memory_space<smem>>, %arg3: memref<2xf32, #tpu.memory_space<smem>>, %arg4: memref<16x128xf32, #tpu.memory_space<vmem>>, %arg5: memref<8x16x128xf32, #tpu.memory_space<vmem>>) attributes {dimension_semantics = [#tpu.dimension_semantics<parallel>, #tpu.dimension_semantics<parallel>], iteration_bounds = array<i64: 1, 1>, scalar_prefetch = 0 : i64, scratch_operands = 0 : i64, tpu.core_type = #tpu.core_type<tc>, window_params = [{transform_indices = @transform_0, window_bounds = array<i64: 1>}, {transform_indices = @transform_1, window_bounds = array<i64: 2>}, {transform_indices = @transform_2, window_bounds = array<i64: 16, 128>}, {transform_indices = @transform_3, window_bounds = array<i64: 8, 16, 128>}]} {
    %c0 = arith.constant 0 : index
    %0 = memref.load %arg3[%c0] : memref<2xf32, #tpu.memory_space<smem>>
    %c1 = arith.constant 1 : index
    %1 = memref.load %arg3[%c1] : memref<2xf32, #tpu.memory_space<smem>>
    %c0_0 = arith.constant 0 : index
    %2 = memref.load %arg2[%c0_0] : memref<1xi32, #tpu.memory_space<smem>>
    %c0_1 = arith.constant 0 : index
    %c0_2 = arith.constant 0 : index
    %3 = vector.load %arg4[%c0_1, %c0_2] : memref<16x128xf32, #tpu.memory_space<vmem>>, vector<16x128xf32>
    %4 = vector.broadcast %0 : f32 to vector<16x128xf32>
    %5 = arith.subf %3, %4 : vector<16x128xf32>
    %6 = vector.broadcast %1 : f32 to vector<16x128xf32>
    %7 = arith.mulf %5, %6 : vector<16x128xf32>
    %8 = arith.fptosi %7 : vector<16x128xf32> to vector<16x128xi32>
    %9 = tpu.iota {dimensions = array<i32: 0>} : vector<16x128xi32>
    %10 = tpu.iota {dimensions = array<i32: 1>} : vector<16x128xi32>
    %c16_i32 = arith.constant 16 : i32
    %11 = arith.muli %arg0, %c16_i32 : i32
    %12 = vector.broadcast %11 : i32 to vector<16x128xi32>
    %13 = arith.addi %12, %9 : vector<16x128xi32>
    %c128_i32 = arith.constant 128 : i32
    %14 = vector.broadcast %c128_i32 : i32 to vector<16x128xi32>
    %15 = arith.muli %13, %14 : vector<16x128xi32>
    %16 = arith.addi %15, %10 : vector<16x128xi32>
    %c8_i32 = arith.constant 8 : i32
    %17 = arith.muli %arg1, %c8_i32 : i32
    %c0_i32 = arith.constant 0 : i32
    %18 = arith.addi %17, %c0_i32 : i32
    %c-1640531527_i32 = arith.constant -1640531527 : i32
    %19 = arith.muli %18, %c-1640531527_i32 : i32
    %20 = arith.addi %2, %19 : i32
    %c-862048943_i32 = arith.constant -862048943 : i32
    %21 = vector.broadcast %c-862048943_i32 : i32 to vector<16x128xi32>
    %22 = arith.muli %16, %21 : vector<16x128xi32>
    %c15_i32 = arith.constant 15 : i32
    %23 = vector.broadcast %c15_i32 : i32 to vector<16x128xi32>
    %24 = arith.shli %22, %23 : vector<16x128xi32>
    %c17_i32 = arith.constant 17 : i32
    %25 = vector.broadcast %c17_i32 : i32 to vector<16x128xi32>
    %26 = arith.shrui %22, %25 : vector<16x128xi32>
    %27 = arith.ori %24, %26 : vector<16x128xi32>
    %c461845907_i32 = arith.constant 461845907 : i32
    %28 = vector.broadcast %c461845907_i32 : i32 to vector<16x128xi32>
    %29 = arith.muli %27, %28 : vector<16x128xi32>
    %30 = vector.broadcast %20 : i32 to vector<16x128xi32>
    %31 = arith.xori %30, %29 : vector<16x128xi32>
    %c13_i32 = arith.constant 13 : i32
    %32 = vector.broadcast %c13_i32 : i32 to vector<16x128xi32>
    %33 = arith.shli %31, %32 : vector<16x128xi32>
    %c19_i32 = arith.constant 19 : i32
    %34 = vector.broadcast %c19_i32 : i32 to vector<16x128xi32>
    %35 = arith.shrui %31, %34 : vector<16x128xi32>
    %36 = arith.ori %33, %35 : vector<16x128xi32>
    %c5_i32 = arith.constant 5 : i32
    %37 = vector.broadcast %c5_i32 : i32 to vector<16x128xi32>
    %38 = arith.muli %36, %37 : vector<16x128xi32>
    %c-430675100_i32 = arith.constant -430675100 : i32
    %39 = vector.broadcast %c-430675100_i32 : i32 to vector<16x128xi32>
    %40 = arith.addi %38, %39 : vector<16x128xi32>
    %c16_i32_3 = arith.constant 16 : i32
    %41 = vector.broadcast %c16_i32_3 : i32 to vector<16x128xi32>
    %42 = arith.shrui %40, %41 : vector<16x128xi32>
    %43 = arith.xori %40, %42 : vector<16x128xi32>
    %c-2048144789_i32 = arith.constant -2048144789 : i32
    %44 = vector.broadcast %c-2048144789_i32 : i32 to vector<16x128xi32>
    %45 = arith.muli %43, %44 : vector<16x128xi32>
    %c13_i32_4 = arith.constant 13 : i32
    %46 = vector.broadcast %c13_i32_4 : i32 to vector<16x128xi32>
    %47 = arith.shrui %45, %46 : vector<16x128xi32>
    %48 = arith.xori %45, %47 : vector<16x128xi32>
    %c-1028477387_i32 = arith.constant -1028477387 : i32
    %49 = vector.broadcast %c-1028477387_i32 : i32 to vector<16x128xi32>
    %50 = arith.muli %48, %49 : vector<16x128xi32>
    %c16_i32_5 = arith.constant 16 : i32
    %51 = vector.broadcast %c16_i32_5 : i32 to vector<16x128xi32>
    %52 = arith.shrui %50, %51 : vector<16x128xi32>
    %53 = arith.xori %50, %52 : vector<16x128xi32>
    %c8_i32_6 = arith.constant 8 : i32
    %54 = vector.broadcast %c8_i32_6 : i32 to vector<16x128xi32>
    %55 = arith.shrui %53, %54 : vector<16x128xi32>
    %56 = arith.cmpi slt, %55, %8 : vector<16x128xi32>
    %57 = arith.extui %56 : vector<16x128xi1> to vector<16x128xi32>
    %58 = arith.sitofp %57 : vector<16x128xi32> to vector<16x128xf32>
    %c0_7 = arith.constant 0 : index
    %c0_8 = arith.constant 0 : index
    %c0_9 = arith.constant 0 : index
    %59 = vector.load %arg5[%c0_7, %c0_8, %c0_9] : memref<8x16x128xf32, #tpu.memory_space<vmem>>, vector<1x16x128xf32>
    %60 = vector.shape_cast %59 : vector<1x16x128xf32> to vector<16x128xf32>
    %61 = vector.shape_cast %58 : vector<16x128xf32> to vector<1x16x128xf32>
    tpu.vector_store %arg5[%c0_7, %c0_8, %c0_9], %61 {strides = array<i32>} : memref<8x16x128xf32, #tpu.memory_space<vmem>>, vector<1x16x128xf32>,
    %c1_i32 = arith.constant 1 : i32
    %62 = arith.addi %17, %c1_i32 : i32
    %c-1640531527_i32_10 = arith.constant -1640531527 : i32
    %63 = arith.muli %62, %c-1640531527_i32_10 : i32
    %64 = arith.addi %2, %63 : i32
    %c-862048943_i32_11 = arith.constant -862048943 : i32
    %65 = vector.broadcast %c-862048943_i32_11 : i32 to vector<16x128xi32>
    %66 = arith.muli %16, %65 : vector<16x128xi32>
    %c15_i32_12 = arith.constant 15 : i32
    %67 = vector.broadcast %c15_i32_12 : i32 to vector<16x128xi32>
    %68 = arith.shli %66, %67 : vector<16x128xi32>
    %c17_i32_13 = arith.constant 17 : i32
    %69 = vector.broadcast %c17_i32_13 : i32 to vector<16x128xi32>
    %70 = arith.shrui %66, %69 : vector<16x128xi32>
    %71 = arith.ori %68, %70 : vector<16x128xi32>
    %c461845907_i32_14 = arith.constant 461845907 : i32
    %72 = vector.broadcast %c461845907_i32_14 : i32 to vector<16x128xi32>
    %73 = arith.muli %71, %72 : vector<16x128xi32>
    %74 = vector.broadcast %64 : i32 to vector<16x128xi32>
    %75 = arith.xori %74, %73 : vector<16x128xi32>
    %c13_i32_15 = arith.constant 13 : i32
    %76 = vector.broadcast %c13_i32_15 : i32 to vector<16x128xi32>
    %77 = arith.shli %75, %76 : vector<16x128xi32>
    %c19_i32_16 = arith.constant 19 : i32
    %78 = vector.broadcast %c19_i32_16 : i32 to vector<16x128xi32>
    %79 = arith.shrui %75, %78 : vector<16x128xi32>
    %80 = arith.ori %77, %79 : vector<16x128xi32>
    %c5_i32_17 = arith.constant 5 : i32
    %81 = vector.broadcast %c5_i32_17 : i32 to vector<16x128xi32>
    %82 = arith.muli %80, %81 : vector<16x128xi32>
    %c-430675100_i32_18 = arith.constant -430675100 : i32
    %83 = vector.broadcast %c-430675100_i32_18 : i32 to vector<16x128xi32>
    %84 = arith.addi %82, %83 : vector<16x128xi32>
    %c16_i32_19 = arith.constant 16 : i32
    %85 = vector.broadcast %c16_i32_19 : i32 to vector<16x128xi32>
    %86 = arith.shrui %84, %85 : vector<16x128xi32>
    %87 = arith.xori %84, %86 : vector<16x128xi32>
    %c-2048144789_i32_20 = arith.constant -2048144789 : i32
    %88 = vector.broadcast %c-2048144789_i32_20 : i32 to vector<16x128xi32>
    %89 = arith.muli %87, %88 : vector<16x128xi32>
    %c13_i32_21 = arith.constant 13 : i32
    %90 = vector.broadcast %c13_i32_21 : i32 to vector<16x128xi32>
    %91 = arith.shrui %89, %90 : vector<16x128xi32>
    %92 = arith.xori %89, %91 : vector<16x128xi32>
    %c-1028477387_i32_22 = arith.constant -1028477387 : i32
    %93 = vector.broadcast %c-1028477387_i32_22 : i32 to vector<16x128xi32>
    %94 = arith.muli %92, %93 : vector<16x128xi32>
    %c16_i32_23 = arith.constant 16 : i32
    %95 = vector.broadcast %c16_i32_23 : i32 to vector<16x128xi32>
    %96 = arith.shrui %94, %95 : vector<16x128xi32>
    %97 = arith.xori %94, %96 : vector<16x128xi32>
    %c8_i32_24 = arith.constant 8 : i32
    %98 = vector.broadcast %c8_i32_24 : i32 to vector<16x128xi32>
    %99 = arith.shrui %97, %98 : vector<16x128xi32>
    %100 = arith.cmpi slt, %99, %8 : vector<16x128xi32>
    %101 = arith.extui %100 : vector<16x128xi1> to vector<16x128xi32>
    %102 = arith.sitofp %101 : vector<16x128xi32> to vector<16x128xf32>
    %c1_25 = arith.constant 1 : index
    %c0_26 = arith.constant 0 : index
    %c0_27 = arith.constant 0 : index
    %103 = vector.load %arg5[%c1_25, %c0_26, %c0_27] : memref<8x16x128xf32, #tpu.memory_space<vmem>>, vector<1x16x128xf32>
    %104 = vector.shape_cast %103 : vector<1x16x128xf32> to vector<16x128xf32>
    %105 = vector.shape_cast %102 : vector<16x128xf32> to vector<1x16x128xf32>
    tpu.vector_store %arg5[%c1_25, %c0_26, %c0_27], %105 {strides = array<i32>} : memref<8x16x128xf32, #tpu.memory_space<vmem>>, vector<1x16x128xf32>,
    %c2_i32 = arith.constant 2 : i32
    %106 = arith.addi %17, %c2_i32 : i32
    %c-1640531527_i32_28 = arith.constant -1640531527 : i32
    %107 = arith.muli %106, %c-1640531527_i32_28 : i32
    %108 = arith.addi %2, %107 : i32
    %c-862048943_i32_29 = arith.constant -862048943 : i32
    %109 = vector.broadcast %c-862048943_i32_29 : i32 to vector<16x128xi32>
    %110 = arith.muli %16, %109 : vector<16x128xi32>
    %c15_i32_30 = arith.constant 15 : i32
    %111 = vector.broadcast %c15_i32_30 : i32 to vector<16x128xi32>
    %112 = arith.shli %110, %111 : vector<16x128xi32>
    %c17_i32_31 = arith.constant 17 : i32
    %113 = vector.broadcast %c17_i32_31 : i32 to vector<16x128xi32>
    %114 = arith.shrui %110, %113 : vector<16x128xi32>
    %115 = arith.ori %112, %114 : vector<16x128xi32>
    %c461845907_i32_32 = arith.constant 461845907 : i32
    %116 = vector.broadcast %c461845907_i32_32 : i32 to vector<16x128xi32>
    %117 = arith.muli %115, %116 : vector<16x128xi32>
    %118 = vector.broadcast %108 : i32 to vector<16x128xi32>
    %119 = arith.xori %118, %117 : vector<16x128xi32>
    %c13_i32_33 = arith.constant 13 : i32
    %120 = vector.broadcast %c13_i32_33 : i32 to vector<16x128xi32>
    %121 = arith.shli %119, %120 : vector<16x128xi32>
    %c19_i32_34 = arith.constant 19 : i32
    %122 = vector.broadcast %c19_i32_34 : i32 to vector<16x128xi32>
    %123 = arith.shrui %119, %122 : vector<16x128xi32>
    %124 = arith.ori %121, %123 : vector<16x128xi32>
    %c5_i32_35 = arith.constant 5 : i32
    %125 = vector.broadcast %c5_i32_35 : i32 to vector<16x128xi32>
    %126 = arith.muli %124, %125 : vector<16x128xi32>
    %c-430675100_i32_36 = arith.constant -430675100 : i32
    %127 = vector.broadcast %c-430675100_i32_36 : i32 to vector<16x128xi32>
    %128 = arith.addi %126, %127 : vector<16x128xi32>
    %c16_i32_37 = arith.constant 16 : i32
    %129 = vector.broadcast %c16_i32_37 : i32 to vector<16x128xi32>
    %130 = arith.shrui %128, %129 : vector<16x128xi32>
    %131 = arith.xori %128, %130 : vector<16x128xi32>
    %c-2048144789_i32_38 = arith.constant -2048144789 : i32
    %132 = vector.broadcast %c-2048144789_i32_38 : i32 to vector<16x128xi32>
    %133 = arith.muli %131, %132 : vector<16x128xi32>
    %c13_i32_39 = arith.constant 13 : i32
    %134 = vector.broadcast %c13_i32_39 : i32 to vector<16x128xi32>
    %135 = arith.shrui %133, %134 : vector<16x128xi32>
    %136 = arith.xori %133, %135 : vector<16x128xi32>
    %c-1028477387_i32_40 = arith.constant -1028477387 : i32
    %137 = vector.broadcast %c-1028477387_i32_40 : i32 to vector<16x128xi32>
    %138 = arith.muli %136, %137 : vector<16x128xi32>
    %c16_i32_41 = arith.constant 16 : i32
    %139 = vector.broadcast %c16_i32_41 : i32 to vector<16x128xi32>
    %140 = arith.shrui %138, %139 : vector<16x128xi32>
    %141 = arith.xori %138, %140 : vector<16x128xi32>
    %c8_i32_42 = arith.constant 8 : i32
    %142 = vector.broadcast %c8_i32_42 : i32 to vector<16x128xi32>
    %143 = arith.shrui %141, %142 : vector<16x128xi32>
    %144 = arith.cmpi slt, %143, %8 : vector<16x128xi32>
    %145 = arith.extui %144 : vector<16x128xi1> to vector<16x128xi32>
    %146 = arith.sitofp %145 : vector<16x128xi32> to vector<16x128xf32>
    %c2 = arith.constant 2 : index
    %c0_43 = arith.constant 0 : index
    %c0_44 = arith.constant 0 : index
    %147 = vector.load %arg5[%c2, %c0_43, %c0_44] : memref<8x16x128xf32, #tpu.memory_space<vmem>>, vector<1x16x128xf32>
    %148 = vector.shape_cast %147 : vector<1x16x128xf32> to vector<16x128xf32>
    %149 = vector.shape_cast %146 : vector<16x128xf32> to vector<1x16x128xf32>
    tpu.vector_store %arg5[%c2, %c0_43, %c0_44], %149 {strides = array<i32>} : memref<8x16x128xf32, #tpu.memory_space<vmem>>, vector<1x16x128xf32>,
    %c3_i32 = arith.constant 3 : i32
    %150 = arith.addi %17, %c3_i32 : i32
    %c-1640531527_i32_45 = arith.constant -1640531527 : i32
    %151 = arith.muli %150, %c-1640531527_i32_45 : i32
    %152 = arith.addi %2, %151 : i32
    %c-862048943_i32_46 = arith.constant -862048943 : i32
    %153 = vector.broadcast %c-862048943_i32_46 : i32 to vector<16x128xi32>
    %154 = arith.muli %16, %153 : vector<16x128xi32>
    %c15_i32_47 = arith.constant 15 : i32
    %155 = vector.broadcast %c15_i32_47 : i32 to vector<16x128xi32>
    %156 = arith.shli %154, %155 : vector<16x128xi32>
    %c17_i32_48 = arith.constant 17 : i32
    %157 = vector.broadcast %c17_i32_48 : i32 to vector<16x128xi32>
    %158 = arith.shrui %154, %157 : vector<16x128xi32>
    %159 = arith.ori %156, %158 : vector<16x128xi32>
    %c461845907_i32_49 = arith.constant 461845907 : i32
    %160 = vector.broadcast %c461845907_i32_49 : i32 to vector<16x128xi32>
    %161 = arith.muli %159, %160 : vector<16x128xi32>
    %162 = vector.broadcast %152 : i32 to vector<16x128xi32>
    %163 = arith.xori %162, %161 : vector<16x128xi32>
    %c13_i32_50 = arith.constant 13 : i32
    %164 = vector.broadcast %c13_i32_50 : i32 to vector<16x128xi32>
    %165 = arith.shli %163, %164 : vector<16x128xi32>
    %c19_i32_51 = arith.constant 19 : i32
    %166 = vector.broadcast %c19_i32_51 : i32 to vector<16x128xi32>
    %167 = arith.shrui %163, %166 : vector<16x128xi32>
    %168 = arith.ori %165, %167 : vector<16x128xi32>
    %c5_i32_52 = arith.constant 5 : i32
    %169 = vector.broadcast %c5_i32_52 : i32 to vector<16x128xi32>
    %170 = arith.muli %168, %169 : vector<16x128xi32>
    %c-430675100_i32_53 = arith.constant -430675100 : i32
    %171 = vector.broadcast %c-430675100_i32_53 : i32 to vector<16x128xi32>
    %172 = arith.addi %170, %171 : vector<16x128xi32>
    %c16_i32_54 = arith.constant 16 : i32
    %173 = vector.broadcast %c16_i32_54 : i32 to vector<16x128xi32>
    %174 = arith.shrui %172, %173 : vector<16x128xi32>
    %175 = arith.xori %172, %174 : vector<16x128xi32>
    %c-2048144789_i32_55 = arith.constant -2048144789 : i32
    %176 = vector.broadcast %c-2048144789_i32_55 : i32 to vector<16x128xi32>
    %177 = arith.muli %175, %176 : vector<16x128xi32>
    %c13_i32_56 = arith.constant 13 : i32
    %178 = vector.broadcast %c13_i32_56 : i32 to vector<16x128xi32>
    %179 = arith.shrui %177, %178 : vector<16x128xi32>
    %180 = arith.xori %177, %179 : vector<16x128xi32>
    %c-1028477387_i32_57 = arith.constant -1028477387 : i32
    %181 = vector.broadcast %c-1028477387_i32_57 : i32 to vector<16x128xi32>
    %182 = arith.muli %180, %181 : vector<16x128xi32>
    %c16_i32_58 = arith.constant 16 : i32
    %183 = vector.broadcast %c16_i32_58 : i32 to vector<16x128xi32>
    %184 = arith.shrui %182, %183 : vector<16x128xi32>
    %185 = arith.xori %182, %184 : vector<16x128xi32>
    %c8_i32_59 = arith.constant 8 : i32
    %186 = vector.broadcast %c8_i32_59 : i32 to vector<16x128xi32>
    %187 = arith.shrui %185, %186 : vector<16x128xi32>
    %188 = arith.cmpi slt, %187, %8 : vector<16x128xi32>
    %189 = arith.extui %188 : vector<16x128xi1> to vector<16x128xi32>
    %190 = arith.sitofp %189 : vector<16x128xi32> to vector<16x128xf32>
    %c3 = arith.constant 3 : index
    %c0_60 = arith.constant 0 : index
    %c0_61 = arith.constant 0 : index
    %191 = vector.load %arg5[%c3, %c0_60, %c0_61] : memref<8x16x128xf32, #tpu.memory_space<vmem>>, vector<1x16x128xf32>
    %192 = vector.shape_cast %191 : vector<1x16x128xf32> to vector<16x128xf32>
    %193 = vector.shape_cast %190 : vector<16x128xf32> to vector<1x16x128xf32>
    tpu.vector_store %arg5[%c3, %c0_60, %c0_61], %193 {strides = array<i32>} : memref<8x16x128xf32, #tpu.memory_space<vmem>>, vector<1x16x128xf32>,
    %c4_i32 = arith.constant 4 : i32
    %194 = arith.addi %17, %c4_i32 : i32
    %c-1640531527_i32_62 = arith.constant -1640531527 : i32
    %195 = arith.muli %194, %c-1640531527_i32_62 : i32
    %196 = arith.addi %2, %195 : i32
    %c-862048943_i32_63 = arith.constant -862048943 : i32
    %197 = vector.broadcast %c-862048943_i32_63 : i32 to vector<16x128xi32>
    %198 = arith.muli %16, %197 : vector<16x128xi32>
    %c15_i32_64 = arith.constant 15 : i32
    %199 = vector.broadcast %c15_i32_64 : i32 to vector<16x128xi32>
    %200 = arith.shli %198, %199 : vector<16x128xi32>
    %c17_i32_65 = arith.constant 17 : i32
    %201 = vector.broadcast %c17_i32_65 : i32 to vector<16x128xi32>
    %202 = arith.shrui %198, %201 : vector<16x128xi32>
    %203 = arith.ori %200, %202 : vector<16x128xi32>
    %c461845907_i32_66 = arith.constant 461845907 : i32
    %204 = vector.broadcast %c461845907_i32_66 : i32 to vector<16x128xi32>
    %205 = arith.muli %203, %204 : vector<16x128xi32>
    %206 = vector.broadcast %196 : i32 to vector<16x128xi32>
    %207 = arith.xori %206, %205 : vector<16x128xi32>
    %c13_i32_67 = arith.constant 13 : i32
    %208 = vector.broadcast %c13_i32_67 : i32 to vector<16x128xi32>
    %209 = arith.shli %207, %208 : vector<16x128xi32>
    %c19_i32_68 = arith.constant 19 : i32
    %210 = vector.broadcast %c19_i32_68 : i32 to vector<16x128xi32>
    %211 = arith.shrui %207, %210 : vector<16x128xi32>
    %212 = arith.ori %209, %211 : vector<16x128xi32>
    %c5_i32_69 = arith.constant 5 : i32
    %213 = vector.broadcast %c5_i32_69 : i32 to vector<16x128xi32>
    %214 = arith.muli %212, %213 : vector<16x128xi32>
    %c-430675100_i32_70 = arith.constant -430675100 : i32
    %215 = vector.broadcast %c-430675100_i32_70 : i32 to vector<16x128xi32>
    %216 = arith.addi %214, %215 : vector<16x128xi32>
    %c16_i32_71 = arith.constant 16 : i32
    %217 = vector.broadcast %c16_i32_71 : i32 to vector<16x128xi32>
    %218 = arith.shrui %216, %217 : vector<16x128xi32>
    %219 = arith.xori %216, %218 : vector<16x128xi32>
    %c-2048144789_i32_72 = arith.constant -2048144789 : i32
    %220 = vector.broadcast %c-2048144789_i32_72 : i32 to vector<16x128xi32>
    %221 = arith.muli %219, %220 : vector<16x128xi32>
    %c13_i32_73 = arith.constant 13 : i32
    %222 = vector.broadcast %c13_i32_73 : i32 to vector<16x128xi32>
    %223 = arith.shrui %221, %222 : vector<16x128xi32>
    %224 = arith.xori %221, %223 : vector<16x128xi32>
    %c-1028477387_i32_74 = arith.constant -1028477387 : i32
    %225 = vector.broadcast %c-1028477387_i32_74 : i32 to vector<16x128xi32>
    %226 = arith.muli %224, %225 : vector<16x128xi32>
    %c16_i32_75 = arith.constant 16 : i32
    %227 = vector.broadcast %c16_i32_75 : i32 to vector<16x128xi32>
    %228 = arith.shrui %226, %227 : vector<16x128xi32>
    %229 = arith.xori %226, %228 : vector<16x128xi32>
    %c8_i32_76 = arith.constant 8 : i32
    %230 = vector.broadcast %c8_i32_76 : i32 to vector<16x128xi32>
    %231 = arith.shrui %229, %230 : vector<16x128xi32>
    %232 = arith.cmpi slt, %231, %8 : vector<16x128xi32>
    %233 = arith.extui %232 : vector<16x128xi1> to vector<16x128xi32>
    %234 = arith.sitofp %233 : vector<16x128xi32> to vector<16x128xf32>
    %c4 = arith.constant 4 : index
    %c0_77 = arith.constant 0 : index
    %c0_78 = arith.constant 0 : index
    %235 = vector.load %arg5[%c4, %c0_77, %c0_78] : memref<8x16x128xf32, #tpu.memory_space<vmem>>, vector<1x16x128xf32>
    %236 = vector.shape_cast %235 : vector<1x16x128xf32> to vector<16x128xf32>
    %237 = vector.shape_cast %234 : vector<16x128xf32> to vector<1x16x128xf32>
    tpu.vector_store %arg5[%c4, %c0_77, %c0_78], %237 {strides = array<i32>} : memref<8x16x128xf32, #tpu.memory_space<vmem>>, vector<1x16x128xf32>,
    %c5_i32_79 = arith.constant 5 : i32
    %238 = arith.addi %17, %c5_i32_79 : i32
    %c-1640531527_i32_80 = arith.constant -1640531527 : i32
    %239 = arith.muli %238, %c-1640531527_i32_80 : i32
    %240 = arith.addi %2, %239 : i32
    %c-862048943_i32_81 = arith.constant -862048943 : i32
    %241 = vector.broadcast %c-862048943_i32_81 : i32 to vector<16x128xi32>
    %242 = arith.muli %16, %241 : vector<16x128xi32>
    %c15_i32_82 = arith.constant 15 : i32
    %243 = vector.broadcast %c15_i32_82 : i32 to vector<16x128xi32>
    %244 = arith.shli %242, %243 : vector<16x128xi32>
    %c17_i32_83 = arith.constant 17 : i32
    %245 = vector.broadcast %c17_i32_83 : i32 to vector<16x128xi32>
    %246 = arith.shrui %242, %245 : vector<16x128xi32>
    %247 = arith.ori %244, %246 : vector<16x128xi32>
    %c461845907_i32_84 = arith.constant 461845907 : i32
    %248 = vector.broadcast %c461845907_i32_84 : i32 to vector<16x128xi32>
    %249 = arith.muli %247, %248 : vector<16x128xi32>
    %250 = vector.broadcast %240 : i32 to vector<16x128xi32>
    %251 = arith.xori %250, %249 : vector<16x128xi32>
    %c13_i32_85 = arith.constant 13 : i32
    %252 = vector.broadcast %c13_i32_85 : i32 to vector<16x128xi32>
    %253 = arith.shli %251, %252 : vector<16x128xi32>
    %c19_i32_86 = arith.constant 19 : i32
    %254 = vector.broadcast %c19_i32_86 : i32 to vector<16x128xi32>
    %255 = arith.shrui %251, %254 : vector<16x128xi32>
    %256 = arith.ori %253, %255 : vector<16x128xi32>
    %c5_i32_87 = arith.constant 5 : i32
    %257 = vector.broadcast %c5_i32_87 : i32 to vector<16x128xi32>
    %258 = arith.muli %256, %257 : vector<16x128xi32>
    %c-430675100_i32_88 = arith.constant -430675100 : i32
    %259 = vector.broadcast %c-430675100_i32_88 : i32 to vector<16x128xi32>
    %260 = arith.addi %258, %259 : vector<16x128xi32>
    %c16_i32_89 = arith.constant 16 : i32
    %261 = vector.broadcast %c16_i32_89 : i32 to vector<16x128xi32>
    %262 = arith.shrui %260, %261 : vector<16x128xi32>
    %263 = arith.xori %260, %262 : vector<16x128xi32>
    %c-2048144789_i32_90 = arith.constant -2048144789 : i32
    %264 = vector.broadcast %c-2048144789_i32_90 : i32 to vector<16x128xi32>
    %265 = arith.muli %263, %264 : vector<16x128xi32>
    %c13_i32_91 = arith.constant 13 : i32
    %266 = vector.broadcast %c13_i32_91 : i32 to vector<16x128xi32>
    %267 = arith.shrui %265, %266 : vector<16x128xi32>
    %268 = arith.xori %265, %267 : vector<16x128xi32>
    %c-1028477387_i32_92 = arith.constant -1028477387 : i32
    %269 = vector.broadcast %c-1028477387_i32_92 : i32 to vector<16x128xi32>
    %270 = arith.muli %268, %269 : vector<16x128xi32>
    %c16_i32_93 = arith.constant 16 : i32
    %271 = vector.broadcast %c16_i32_93 : i32 to vector<16x128xi32>
    %272 = arith.shrui %270, %271 : vector<16x128xi32>
    %273 = arith.xori %270, %272 : vector<16x128xi32>
    %c8_i32_94 = arith.constant 8 : i32
    %274 = vector.broadcast %c8_i32_94 : i32 to vector<16x128xi32>
    %275 = arith.shrui %273, %274 : vector<16x128xi32>
    %276 = arith.cmpi slt, %275, %8 : vector<16x128xi32>
    %277 = arith.extui %276 : vector<16x128xi1> to vector<16x128xi32>
    %278 = arith.sitofp %277 : vector<16x128xi32> to vector<16x128xf32>
    %c5 = arith.constant 5 : index
    %c0_95 = arith.constant 0 : index
    %c0_96 = arith.constant 0 : index
    %279 = vector.load %arg5[%c5, %c0_95, %c0_96] : memref<8x16x128xf32, #tpu.memory_space<vmem>>, vector<1x16x128xf32>
    %280 = vector.shape_cast %279 : vector<1x16x128xf32> to vector<16x128xf32>
    %281 = vector.shape_cast %278 : vector<16x128xf32> to vector<1x16x128xf32>
    tpu.vector_store %arg5[%c5, %c0_95, %c0_96], %281 {strides = array<i32>} : memref<8x16x128xf32, #tpu.memory_space<vmem>>, vector<1x16x128xf32>,
    %c6_i32 = arith.constant 6 : i32
    %282 = arith.addi %17, %c6_i32 : i32
    %c-1640531527_i32_97 = arith.constant -1640531527 : i32
    %283 = arith.muli %282, %c-1640531527_i32_97 : i32
    %284 = arith.addi %2, %283 : i32
    %c-862048943_i32_98 = arith.constant -862048943 : i32
    %285 = vector.broadcast %c-862048943_i32_98 : i32 to vector<16x128xi32>
    %286 = arith.muli %16, %285 : vector<16x128xi32>
    %c15_i32_99 = arith.constant 15 : i32
    %287 = vector.broadcast %c15_i32_99 : i32 to vector<16x128xi32>
    %288 = arith.shli %286, %287 : vector<16x128xi32>
    %c17_i32_100 = arith.constant 17 : i32
    %289 = vector.broadcast %c17_i32_100 : i32 to vector<16x128xi32>
    %290 = arith.shrui %286, %289 : vector<16x128xi32>
    %291 = arith.ori %288, %290 : vector<16x128xi32>
    %c461845907_i32_101 = arith.constant 461845907 : i32
    %292 = vector.broadcast %c461845907_i32_101 : i32 to vector<16x128xi32>
    %293 = arith.muli %291, %292 : vector<16x128xi32>
    %294 = vector.broadcast %284 : i32 to vector<16x128xi32>
    %295 = arith.xori %294, %293 : vector<16x128xi32>
    %c13_i32_102 = arith.constant 13 : i32
    %296 = vector.broadcast %c13_i32_102 : i32 to vector<16x128xi32>
    %297 = arith.shli %295, %296 : vector<16x128xi32>
    %c19_i32_103 = arith.constant 19 : i32
    %298 = vector.broadcast %c19_i32_103 : i32 to vector<16x128xi32>
    %299 = arith.shrui %295, %298 : vector<16x128xi32>
    %300 = arith.ori %297, %299 : vector<16x128xi32>
    %c5_i32_104 = arith.constant 5 : i32
    %301 = vector.broadcast %c5_i32_104 : i32 to vector<16x128xi32>
    %302 = arith.muli %300, %301 : vector<16x128xi32>
    %c-430675100_i32_105 = arith.constant -430675100 : i32
    %303 = vector.broadcast %c-430675100_i32_105 : i32 to vector<16x128xi32>
    %304 = arith.addi %302, %303 : vector<16x128xi32>
    %c16_i32_106 = arith.constant 16 : i32
    %305 = vector.broadcast %c16_i32_106 : i32 to vector<16x128xi32>
    %306 = arith.shrui %304, %305 : vector<16x128xi32>
    %307 = arith.xori %304, %306 : vector<16x128xi32>
    %c-2048144789_i32_107 = arith.constant -2048144789 : i32
    %308 = vector.broadcast %c-2048144789_i32_107 : i32 to vector<16x128xi32>
    %309 = arith.muli %307, %308 : vector<16x128xi32>
    %c13_i32_108 = arith.constant 13 : i32
    %310 = vector.broadcast %c13_i32_108 : i32 to vector<16x128xi32>
    %311 = arith.shrui %309, %310 : vector<16x128xi32>
    %312 = arith.xori %309, %311 : vector<16x128xi32>
    %c-1028477387_i32_109 = arith.constant -1028477387 : i32
    %313 = vector.broadcast %c-1028477387_i32_109 : i32 to vector<16x128xi32>
    %314 = arith.muli %312, %313 : vector<16x128xi32>
    %c16_i32_110 = arith.constant 16 : i32
    %315 = vector.broadcast %c16_i32_110 : i32 to vector<16x128xi32>
    %316 = arith.shrui %314, %315 : vector<16x128xi32>
    %317 = arith.xori %314, %316 : vector<16x128xi32>
    %c8_i32_111 = arith.constant 8 : i32
    %318 = vector.broadcast %c8_i32_111 : i32 to vector<16x128xi32>
    %319 = arith.shrui %317, %318 : vector<16x128xi32>
    %320 = arith.cmpi slt, %319, %8 : vector<16x128xi32>
    %321 = arith.extui %320 : vector<16x128xi1> to vector<16x128xi32>
    %322 = arith.sitofp %321 : vector<16x128xi32> to vector<16x128xf32>
    %c6 = arith.constant 6 : index
    %c0_112 = arith.constant 0 : index
    %c0_113 = arith.constant 0 : index
    %323 = vector.load %arg5[%c6, %c0_112, %c0_113] : memref<8x16x128xf32, #tpu.memory_space<vmem>>, vector<1x16x128xf32>
    %324 = vector.shape_cast %323 : vector<1x16x128xf32> to vector<16x128xf32>
    %325 = vector.shape_cast %322 : vector<16x128xf32> to vector<1x16x128xf32>
    tpu.vector_store %arg5[%c6, %c0_112, %c0_113], %325 {strides = array<i32>} : memref<8x16x128xf32, #tpu.memory_space<vmem>>, vector<1x16x128xf32>,
    %c7_i32 = arith.constant 7 : i32
    %326 = arith.addi %17, %c7_i32 : i32
    %c-1640531527_i32_114 = arith.constant -1640531527 : i32
    %327 = arith.muli %326, %c-1640531527_i32_114 : i32
    %328 = arith.addi %2, %327 : i32
    %c-862048943_i32_115 = arith.constant -862048943 : i32
    %329 = vector.broadcast %c-862048943_i32_115 : i32 to vector<16x128xi32>
    %330 = arith.muli %16, %329 : vector<16x128xi32>
    %c15_i32_116 = arith.constant 15 : i32
    %331 = vector.broadcast %c15_i32_116 : i32 to vector<16x128xi32>
    %332 = arith.shli %330, %331 : vector<16x128xi32>
    %c17_i32_117 = arith.constant 17 : i32
    %333 = vector.broadcast %c17_i32_117 : i32 to vector<16x128xi32>
    %334 = arith.shrui %330, %333 : vector<16x128xi32>
    %335 = arith.ori %332, %334 : vector<16x128xi32>
    %c461845907_i32_118 = arith.constant 461845907 : i32
    %336 = vector.broadcast %c461845907_i32_118 : i32 to vector<16x128xi32>
    %337 = arith.muli %335, %336 : vector<16x128xi32>
    %338 = vector.broadcast %328 : i32 to vector<16x128xi32>
    %339 = arith.xori %338, %337 : vector<16x128xi32>
    %c13_i32_119 = arith.constant 13 : i32
    %340 = vector.broadcast %c13_i32_119 : i32 to vector<16x128xi32>
    %341 = arith.shli %339, %340 : vector<16x128xi32>
    %c19_i32_120 = arith.constant 19 : i32
    %342 = vector.broadcast %c19_i32_120 : i32 to vector<16x128xi32>
    %343 = arith.shrui %339, %342 : vector<16x128xi32>
    %344 = arith.ori %341, %343 : vector<16x128xi32>
    %c5_i32_121 = arith.constant 5 : i32
    %345 = vector.broadcast %c5_i32_121 : i32 to vector<16x128xi32>
    %346 = arith.muli %344, %345 : vector<16x128xi32>
    %c-430675100_i32_122 = arith.constant -430675100 : i32
    %347 = vector.broadcast %c-430675100_i32_122 : i32 to vector<16x128xi32>
    %348 = arith.addi %346, %347 : vector<16x128xi32>
    %c16_i32_123 = arith.constant 16 : i32
    %349 = vector.broadcast %c16_i32_123 : i32 to vector<16x128xi32>
    %350 = arith.shrui %348, %349 : vector<16x128xi32>
    %351 = arith.xori %348, %350 : vector<16x128xi32>
    %c-2048144789_i32_124 = arith.constant -2048144789 : i32
    %352 = vector.broadcast %c-2048144789_i32_124 : i32 to vector<16x128xi32>
    %353 = arith.muli %351, %352 : vector<16x128xi32>
    %c13_i32_125 = arith.constant 13 : i32
    %354 = vector.broadcast %c13_i32_125 : i32 to vector<16x128xi32>
    %355 = arith.shrui %353, %354 : vector<16x128xi32>
    %356 = arith.xori %353, %355 : vector<16x128xi32>
    %c-1028477387_i32_126 = arith.constant -1028477387 : i32
    %357 = vector.broadcast %c-1028477387_i32_126 : i32 to vector<16x128xi32>
    %358 = arith.muli %356, %357 : vector<16x128xi32>
    %c16_i32_127 = arith.constant 16 : i32
    %359 = vector.broadcast %c16_i32_127 : i32 to vector<16x128xi32>
    %360 = arith.shrui %358, %359 : vector<16x128xi32>
    %361 = arith.xori %358, %360 : vector<16x128xi32>
    %c8_i32_128 = arith.constant 8 : i32
    %362 = vector.broadcast %c8_i32_128 : i32 to vector<16x128xi32>
    %363 = arith.shrui %361, %362 : vector<16x128xi32>
    %364 = arith.cmpi slt, %363, %8 : vector<16x128xi32>
    %365 = arith.extui %364 : vector<16x128xi1> to vector<16x128xi32>
    %366 = arith.sitofp %365 : vector<16x128xi32> to vector<16x128xf32>
    %c7 = arith.constant 7 : index
    %c0_129 = arith.constant 0 : index
    %c0_130 = arith.constant 0 : index
    %367 = vector.load %arg5[%c7, %c0_129, %c0_130] : memref<8x16x128xf32, #tpu.memory_space<vmem>>, vector<1x16x128xf32>
    %368 = vector.shape_cast %367 : vector<1x16x128xf32> to vector<16x128xf32>
    %369 = vector.shape_cast %366 : vector<16x128xf32> to vector<1x16x128xf32>
    tpu.vector_store %arg5[%c7, %c0_129, %c0_130], %369 {strides = array<i32>} : memref<8x16x128xf32, #tpu.memory_space<vmem>>, vector<1x16x128xf32>,
    return
  }
  func.func @transform_0(%arg0: i32, %arg1: i32) -> i32 {
    %c0_i32 = arith.constant 0 : i32
    %c0_i32_0 = arith.constant 0 : i32
    return %c0_i32 : i32
  }
  func.func @transform_1(%arg0: i32, %arg1: i32) -> i32 {
    %c0_i32 = arith.constant 0 : i32
    %c0_i32_0 = arith.constant 0 : i32
    return %c0_i32 : i32
  }
  func.func @transform_2(%arg0: i32, %arg1: i32) -> (i32, i32) {
    %c0_i32 = arith.constant 0 : i32
    %c0_i32_0 = arith.constant 0 : i32
    return %arg0, %c0_i32 : i32, i32
  }
  func.func @transform_3(%arg0: i32, %arg1: i32) -> (i32, i32, i32) {
    %c0_i32 = arith.constant 0 : i32
    %c0_i32_0 = arith.constant 0 : i32
    return %arg1, %arg0, %c0_i32 : i32, i32, i32
  }
}

</mosaic_0001>

<bundles_post_ra>
// kernel: tpu_custom_call.1
= control target key start
LH: loop header
LB: loop body
LE: loop exit
PB: predicated region body
PF: predicated region fallthrough
CT: control target
= control target key end

     0   :  { %9 = vsyncpa [#allocation6], 0  ;;  %s676_s0 = inlined_call_operand.<no memory space> [shape: s32[1], index: 0, kind: input, shape index: {}]   ;;  %s677_s1 = inlined_call_operand.vmem [shape: f32[2], index: 1, kind: input, shape index: {}]   ;;  %s678_s2 = inlined_call_operand.hbm [shape: f32[16,128], index: 2, kind: input, shape index: {}]   ;;  %s679_s3 = inlined_call_operand.hbm [shape: f32[8,16,128], index: 3, kind: output, shape index: {}]  }
   0x1   :  { %10 = vsyncpa [#allocation4], 0 }
   0x2   :  { %11 = vsyncpa [#allocation5], 0  ;;  %s19_s14 = sshll.u32 %s677_s1, 4  ;;  %s27_s17 = sshll.u32 %s678_s2, 4  ;;  %s20_s14 = int_to_ptr.vmem [resolvable:$true] %s19_s14  ;;  %s28_s17 = int_to_ptr.hbm [resolvable:$true] %s27_s17 }
   0x3   :  { %s543_s18 = smov [#allocation3]   ;;  %s544_s19 = smov [#allocation7]  }
   0x4   :  { %22 = dma.vmem_to_smem %s20_s14, 16, %s543_s18, [#allocation6]  }
   0x5   :  { %s29_s20 = sshll.u32 %s544_s19, 4  ;;  %s545_s21 = smov 128   ;;  %s30_s20 = int_to_ptr.vmem [resolvable:$true] %s29_s20 }
   0x6   :  { %s546_s22 = smov 8  }
   0x7   :  { %35 = dma.hbm_to_vmem [thread:$0]  %s28_s17, 256, %s30_s20, [#allocation4], %s545_s21, %s545_s21, %s546_s22  }
   0x8   :  { %537 = dma.done.wait [#allocation6], 16  }
   0x9   :  { %538 = vsyncadd [#allocation6], 4294967280 }
   0xa   :  { %539 = dma.done.wait [#allocation4], 256  }
   0xb   :  { %540 = vsyncadd [#allocation4], 4294967040 }
   0xc   :  { %44 = sfence }
   0xd   :  { %s45_s1 = sld [smem:[#allocation3]]  ;;  %v58_v0 = vlaneseq  ;;  %v48_v3 = vld [vmem:[#allocation7] sm:$0xff]  ;;  %v49_v5 = vld [vmem:[#allocation7 + $0x8] sm:$0xff]  ;;  %s125_s25 = sadd.s32 2654435769, %s676_s0  ;;  %v84_v16 = vstv %s676_s0 }
   0xe   :  { %s444_s2 = sld [smem:[#allocation3 + $0x1]]  ;;  %s168_s30 = sadd.s32 1013904242, %s676_s0  ;;  %v126_v21 = vstv %s125_s25 }
   0xf   :  { %v59_v1 = vshrl.u32 %v58_v0, 7  ;;  %v62_v2 = vand.u32 127, %v58_v0  ;;  %s211_s6 = sadd.s32 3668340011, %s676_s0  ;;  %s254_s9 = sadd.s32 2027808484, %s676_s0  ;;  %v169_v27 = vstv %s168_s30 }
  0x10   :  { %v212_v31 = vstv %s211_s6  ;;  %v595_v34 = vstv %s254_s9  ;;  %s297_s12 = sadd.s32 387276957, %s676_s0  ;;  %s340_s15 = sadd.s32 3041712726, %s676_s0 }
  0x11   :  { %v67_v4 = vmul.u32 128, %v59_v1  ;;  %v60_v6 = vadd.s32 8, %v59_v1  ;;  %v614_v44 = vstv %s297_s12  ;;  %s383_s18 = sadd.s32 1401181199, %s676_s0  ;;  %s548_s0 = smov [#allocation8]  }
  0x12   :  { %s428_s19 = sshll.u32 %s548_s0, 4  ;;  %s429_s19 = int_to_ptr.vmem [resolvable:$true] %s428_s19 }
  0x13   :  { %v50_v7 = vstv %s45_s1  ;;  %v69_v8 = vadd.s32 %v67_v4, %v62_v2  ;;  %v68_v9 = vmul.u32 128, %v60_v6 }
  0x14   :  { %v51_v10 = vsub.f32 %v48_v3, %v50_v7  ;;  %v53_v11 = vstv %s444_s2  ;;  %v52_v12 = vsub.f32 %v49_v5, %v50_v7  ;;  %s430_s2 = sshll.u32 %s679_s3, 4  ;;  %s431_s2 = int_to_ptr.hbm [resolvable:$true] %s430_s2 }
  0x15   :  { %v74_v13 = vmul.u32 3432918353, %v69_v8  ;;  %v70_v14 = vadd.s32 %v68_v9, %v62_v2 }
  0x16   :  { %v54_v15 = vmul.f32 %v53_v11, %v51_v10  ;;  %v55_v17 = vmul.f32 %v53_v11, %v52_v12 }
  0x17   :  { %v76_v18 = vshll.u32 %v74_v13, 15  ;;  %v78_v19 = vshrl.u32 %v74_v13, 17  ;;  %v75_v20 = vmul.u32 3432918353, %v70_v14 }
  0x18   :  { %vm461_vm0 = vcmp.lt.s32.totalorder %v54_v15, 0  ;;  %v462_v22 = vceil.f32 %v54_v15  ;;  %v463_v23 = vfloor.f32 %v54_v15  ;;  %vm466_vm1 = vcmp.lt.s32.totalorder %v55_v17, 0 }
  0x19   :  { %v80_v24 = vor.u32 %v78_v19, %v76_v18  ;;  %v467_v25 = vceil.f32 %v55_v17  ;;  %v468_v26 = vfloor.f32 %v55_v17  ;;  %v77_v29 = vshll.u32 %v75_v20, 15 }
  0x1a   :  { %v464_v28 = vsel %vm461_vm0, %v462_v22, %v463_v23  ;;  %v79_v30 = vshrl.u32 %v75_v20, 17 }
  0x1b   :  { %v593_v32 = vmul.u32 461845907, %v80_v24  ;;  %v469_v33 = vsel %vm466_vm1, %v467_v25, %v468_v26  ;;  %v600_v35 = vcvt.f32.s32 %v464_v28 }
  0x1c   :  { %v81_v36 = vor.u32 %v79_v30, %v77_v29  ;;  %v606_v41 = vcvt.f32.s32 %v469_v33 }
  0x1d   :  { %v85_v37 = vxor.u32 %v84_v16, %v593_v32  ;;  %v127_v38 = vxor.u32 %v126_v21, %v593_v32  ;;  %v170_v39 = vxor.u32 %v169_v27, %v593_v32  ;;  %v213_v40 = vxor.u32 %v212_v31, %v593_v32 }
  0x1e   :  { %v608_v42 = vmul.u32 461845907, %v81_v36  ;;  %v612_v43 = vxor.u32 %v595_v34, %v593_v32 }
  0x1f   :  { %v87_v45 = vshll.u32 %v85_v37, 13  ;;  %v89_v46 = vshrl.u32 %v85_v37, 19  ;;  %v129_v47 = vshll.u32 %v127_v38, 13  ;;  %v131_v48 = vshrl.u32 %v127_v38, 19 }
  0x20   :  { %v86_v49 = vxor.u32 %v84_v16, %v608_v42  ;;  %v128_v50 = vxor.u32 %v126_v21, %v608_v42  ;;  %v172_v51 = vshll.u32 %v170_v39, 13  ;;  %v174_v52 = vshrl.u32 %v170_v39, 19 }
  0x21   :  { %v91_v53 = vor.u32 %v89_v46, %v87_v45  ;;  %v133_v54 = vor.u32 %v131_v48, %v129_v47  ;;  %v171_v55 = vxor.u32 %v169_v27, %v608_v42  ;;  %v215_v56 = vshll.u32 %v213_v40, 13 }
  0x22   :  { %v88_v57 = vshll.u32 %v86_v49, 13  ;;  %v90_v58 = vshrl.u32 %v86_v49, 19  ;;  %v130_v59 = vshll.u32 %v128_v50, 13  ;;  %v132_v60 = vshrl.u32 %v128_v50, 19 }
  0x23   :  { %v93_v61 = vmul.u32 5, %v91_v53  ;;  %v135_v62 = vmul.u32 5, %v133_v54  ;;  %v176_v63 = vor.u32 %v174_v52, %v172_v51  ;;  %v173_v0 = vshll.u32 %v171_v55, 13 }
  0x24   :  { %v92_v1 = vor.u32 %v90_v58, %v88_v57  ;;  %v134_v2 = vor.u32 %v132_v60, %v130_v59  ;;  %v175_v3 = vshrl.u32 %v171_v55, 19  ;;  %v217_v4 = vshrl.u32 %v213_v40, 19 }
  0x25   :  { %v95_v5 = vadd.s32 3864292196, %v93_v61  ;;  %v137_v6 = vadd.s32 3864292196, %v135_v62  ;;  %v178_v7 = vmul.u32 5, %v176_v63  ;;  %v214_v8 = vxor.u32 %v212_v31, %v608_v42 }
  0x26   :  { %v94_v9 = vmul.u32 5, %v92_v1  ;;  %v136_v10 = vmul.u32 5, %v134_v2  ;;  %v177_v11 = vor.u32 %v175_v3, %v173_v0  ;;  %v219_v12 = vor.u32 %v217_v4, %v215_v56 }
  0x27   :  { %v97_v13 = vshrl.u32 %v95_v5, 16  ;;  %v139_v14 = vshrl.u32 %v137_v6, 16  ;;  %v180_v15 = vadd.s32 3864292196, %v178_v7  ;;  %v216_v16 = vshll.u32 %v214_v8, 13 }
  0x28   :  { %v96_v17 = vadd.s32 3864292196, %v94_v9  ;;  %v138_v18 = vadd.s32 3864292196, %v136_v10  ;;  %v179_v19 = vmul.u32 5, %v177_v11  ;;  %v221_v20 = vmul.u32 5, %v219_v12 }
  0x29   :  { %v99_v21 = vxor.u32 %v97_v13, %v95_v5  ;;  %v141_v22 = vxor.u32 %v139_v14, %v137_v6  ;;  %v182_v23 = vshrl.u32 %v180_v15, 16  ;;  %v218_v24 = vshrl.u32 %v214_v8, 19 }
  0x2a   :  { %v98_v25 = vshrl.u32 %v96_v17, 16  ;;  %v140_v26 = vshrl.u32 %v138_v18, 16  ;;  %v181_v27 = vadd.s32 3864292196, %v179_v19  ;;  %v223_v28 = vadd.s32 3864292196, %v221_v20 }
  0x2b   :  { %v101_v29 = vmul.u32 2246822507, %v99_v21  ;;  %v143_v30 = vmul.u32 2246822507, %v141_v22  ;;  %v184_v31 = vxor.u32 %v182_v23, %v180_v15  ;;  %v220_v33 = vor.u32 %v218_v24, %v216_v16 }
  0x2c   :  { %v100_v36 = vxor.u32 %v98_v25, %v96_v17  ;;  %v142_v37 = vxor.u32 %v140_v26, %v138_v18  ;;  %v183_v38 = vshrl.u32 %v181_v27, 16  ;;  %v225_v39 = vshrl.u32 %v223_v28, 16 }
  0x2d   :  { %v103_v40 = vshrl.u32 %v101_v29, 13  ;;  %v145_v45 = vshrl.u32 %v143_v30, 13  ;;  %v186_v46 = vmul.u32 2246822507, %v184_v31  ;;  %v222_v47 = vmul.u32 5, %v220_v33 }
  0x2e   :  { %v102_v48 = vmul.u32 2246822507, %v100_v36  ;;  %v144_v49 = vmul.u32 2246822507, %v142_v37  ;;  %v185_v50 = vxor.u32 %v183_v38, %v181_v27  ;;  %v227_v51 = vxor.u32 %v225_v39, %v223_v28 }
  0x2f   :  { %v105_v52 = vxor.u32 %v103_v40, %v101_v29  ;;  %v147_v53 = vxor.u32 %v145_v45, %v143_v30  ;;  %v188_v54 = vshrl.u32 %v186_v46, 13  ;;  %v224_v55 = vadd.s32 3864292196, %v222_v47 }
  0x30   :  { %v104_v56 = vshrl.u32 %v102_v48, 13  ;;  %v146_v57 = vshrl.u32 %v144_v49, 13  ;;  %v187_v58 = vmul.u32 2246822507, %v185_v50  ;;  %v229_v59 = vmul.u32 2246822507, %v227_v51 }
  0x31   :  { %v107_v60 = vmul.u32 3266489909, %v105_v52  ;;  %v149_v61 = vmul.u32 3266489909, %v147_v53  ;;  %v190_v62 = vxor.u32 %v188_v54, %v186_v46  ;;  %v226_v63 = vshrl.u32 %v224_v55, 16 }
  0x32   :  { %v106_v0 = vxor.u32 %v104_v56, %v102_v48  ;;  %v148_v1 = vxor.u32 %v146_v57, %v144_v49  ;;  %v189_v2 = vshrl.u32 %v187_v58, 13  ;;  %v231_v3 = vshrl.u32 %v229_v59, 13 }
  0x33   :  { %v109_v4 = vshrl.u32 %v107_v60, 16  ;;  %v151_v5 = vshrl.u32 %v149_v61, 16  ;;  %v192_v6 = vmul.u32 3266489909, %v190_v62  ;;  %v228_v7 = vxor.u32 %v226_v63, %v224_v55 }
  0x34   :  { %v108_v8 = vmul.u32 3266489909, %v106_v0  ;;  %v150_v9 = vmul.u32 3266489909, %v148_v1  ;;  %v191_v10 = vxor.u32 %v189_v2, %v187_v58  ;;  %v233_v11 = vxor.u32 %v231_v3, %v229_v59 }
  0x35   :  { %v111_v12 = vxor.u32 %v109_v4, %v107_v60  ;;  %v153_v13 = vxor.u32 %v151_v5, %v149_v61  ;;  %v194_v14 = vshrl.u32 %v192_v6, 16  ;;  %v230_v15 = vmul.u32 2246822507, %v228_v7 }
  0x36   :  { %v110_v16 = vshrl.u32 %v108_v8, 16  ;;  %v152_v17 = vshrl.u32 %v150_v9, 16  ;;  %v193_v18 = vmul.u32 3266489909, %v191_v10  ;;  %v235_v19 = vmul.u32 3266489909, %v233_v11 }
  0x37   :  { %v113_v20 = vshrl.u32 %v111_v12, 8  ;;  %v155_v21 = vshrl.u32 %v153_v13, 8  ;;  %v196_v22 = vxor.u32 %v194_v14, %v192_v6  ;;  %v232_v23 = vshrl.u32 %v230_v15, 13 }
  0x38   :  { %v112_v24 = vxor.u32 %v110_v16, %v108_v8  ;;  %v154_v25 = vxor.u32 %v152_v17, %v150_v9  ;;  %v195_v26 = vshrl.u32 %v193_v18, 16  ;;  %v237_v27 = vshrl.u32 %v235_v19, 16 }
  0x39   :  { %vm115_vm2 = vcmp.lt.s32.totalorder %v113_v20, %v600_v35  ;;  %vm157_vm3 = vcmp.lt.s32.totalorder %v155_v21, %v600_v35  ;;  %v198_v28 = vshrl.u32 %v196_v22, 8  ;;  %v234_v29 = vxor.u32 %v232_v23, %v230_v15 }
  0x3a   :  { %v547_v30 = vmov 0.0   ;;  %v114_v33 = vshrl.u32 %v112_v24, 8  ;;  %v156_v37 = vshrl.u32 %v154_v25, 8  ;;  %v197_v38 = vxor.u32 %v195_v26, %v193_v18 }
  0x3b   :  { %v445_v31 = vsel %vm115_vm2, 1.0, %v547_v30  ;;  %v447_v36 = vsel %vm157_vm3, 1.0, %v547_v30  ;;  %vm200_vm4 = vcmp.lt.s32.totalorder %v198_v28, %v600_v35  ;;  %v239_v39 = vxor.u32 %v237_v27, %v235_v19 }
  0x3c   :  { %121 = vst [vmem:[#allocation8] sm:$0xff] %v445_v31  ;;  %v236_v40 = vmul.u32 3266489909, %v234_v29  ;;  %vm116_vm5 = vcmp.lt.s32.totalorder %v114_v33, %v606_v41  ;;  %vm158_vm6 = vcmp.lt.s32.totalorder %v156_v37, %v606_v41  ;;  %v449_v45 = vsel %vm200_vm4, 1.0, %v547_v30 }
  0x3d   :  { %164 = vst [vmem:[#allocation8 + $0x10] sm:$0xff] %v447_v36  ;;  %v258_v46 = vshll.u32 %v612_v43, 13  ;;  %v446_v47 = vsel %vm116_vm5, 1.0, %v547_v30  ;;  %v448_v48 = vsel %vm158_vm6, 1.0, %v547_v30  ;;  %v199_v49 = vshrl.u32 %v197_v38, 8 }
  0x3e   :  { %207 = vst [vmem:[#allocation8 + $0x20] sm:$0xff] %v449_v45  ;;  %v241_v50 = vshrl.u32 %v239_v39, 8  ;;  %v238_v51 = vshrl.u32 %v236_v40, 16  ;;  %v260_v52 = vshrl.u32 %v612_v43, 19  ;;  %v257_v53 = vxor.u32 %v595_v34, %v608_v42 }
  0x3f   :  { %122 = vst [vmem:[#allocation8 + $0x8] sm:$0xff] %v446_v47  ;;  %v299_v54 = vxor.u32 %v614_v44, %v593_v32  ;;  %vm201_vm7 = vcmp.lt.s32.totalorder %v199_v49, %v606_v41  ;;  %v300_v55 = vxor.u32 %v614_v44, %v608_v42  ;;  %v341_v56 = vstv %s340_s15 }
  0x40   :  { %165 = vst [vmem:[#allocation8 + $0x18] sm:$0xff] %v448_v48  ;;  %vm243_vm8 = vcmp.lt.s32.totalorder %v241_v50, %v600_v35  ;;  %v450_v57 = vsel %vm201_vm7, 1.0, %v547_v30  ;;  %v240_v43 = vxor.u32 %v238_v51, %v236_v40  ;;  %v262_v59 = vor.u32 %v260_v52, %v258_v46 }
  0x41   :  { %v451_v58 = vsel %vm243_vm8, 1.0, %v547_v30  ;;  %208 = vst [vmem:[#allocation8 + $0x28] sm:$0xff] %v450_v57  ;;  %v259_v34 = vshll.u32 %v257_v53, 13  ;;  %v261_v60 = vshrl.u32 %v257_v53, 19  ;;  %v301_v61 = vshll.u32 %v299_v54, 13 }
  0x42   :  { %v303_v62 = vshrl.u32 %v299_v54, 19  ;;  %250 = vst [vmem:[#allocation8 + $0x30] sm:$0xff] %v451_v58  ;;  %v242_v63 = vshrl.u32 %v240_v43, 8  ;;  %v264_v0 = vmul.u32 5, %v262_v59  ;;  %v302_v44 = vshll.u32 %v300_v55, 13 }
  0x43   :  { %v304_v1 = vshrl.u32 %v300_v55, 19  ;;  %v263_v2 = vor.u32 %v261_v60, %v259_v34  ;;  %v342_v4 = vxor.u32 %v341_v56, %v593_v32  ;;  %v343_v5 = vxor.u32 %v341_v56, %v608_v42 }
  0x44   :  { %v305_v3 = vor.u32 %v303_v62, %v301_v61  ;;  %vm244_vm9 = vcmp.lt.s32.totalorder %v242_v63, %v606_v41  ;;  %v266_v6 = vadd.s32 3864292196, %v264_v0  ;;  %v384_v8 = vstv %s383_s18 }
  0x45   :  { %v306_v7 = vor.u32 %v304_v1, %v302_v44  ;;  %v452_v9 = vsel %vm244_vm9, 1.0, %v547_v30  ;;  %v265_v10 = vmul.u32 5, %v263_v2  ;;  %v344_v12 = vshll.u32 %v342_v4, 13 }
  0x46   :  { %v307_v11 = vmul.u32 5, %v305_v3  ;;  %251 = vst [vmem:[#allocation8 + $0x38] sm:$0xff] %v452_v9  ;;  %v268_v13 = vshrl.u32 %v266_v6, 16  ;;  %v346_v15 = vshrl.u32 %v342_v4, 19  ;;  %v345_v16 = vshll.u32 %v343_v5, 13 }
  0x47   :  { %v308_v14 = vmul.u32 5, %v306_v7  ;;  %v267_v17 = vadd.s32 3864292196, %v265_v10  ;;  %v347_v19 = vshrl.u32 %v343_v5, 19  ;;  %v385_v20 = vxor.u32 %v384_v8, %v593_v32 }
  0x48   :  { %v309_v18 = vadd.s32 3864292196, %v307_v11  ;;  %v270_v21 = vxor.u32 %v268_v13, %v266_v6  ;;  %v348_v23 = vor.u32 %v346_v15, %v344_v12  ;;  %v386_v24 = vxor.u32 %v384_v8, %v608_v42 }
  0x49   :  { %v310_v22 = vadd.s32 3864292196, %v308_v14  ;;  %v269_v25 = vshrl.u32 %v267_v17, 16  ;;  %v349_v27 = vor.u32 %v347_v19, %v345_v16  ;;  %v387_v28 = vshll.u32 %v385_v20, 13 }
  0x4a   :  { %v311_v26 = vshrl.u32 %v309_v18, 16  ;;  %v272_v29 = vmul.u32 2246822507, %v270_v21  ;;  %v350_v33 = vmul.u32 5, %v348_v23  ;;  %v389_v36 = vshrl.u32 %v385_v20, 19 }
  0x4b   :  { %v312_v31 = vshrl.u32 %v310_v22, 16  ;;  %v271_v37 = vxor.u32 %v269_v25, %v267_v17  ;;  %v351_v39 = vmul.u32 5, %v349_v27  ;;  %v388_v40 = vshll.u32 %v386_v24, 13 }
  0x4c   :  { %v313_v38 = vxor.u32 %v311_v26, %v309_v18  ;;  %v274_v45 = vshrl.u32 %v272_v29, 13  ;;  %v352_v32 = vadd.s32 3864292196, %v350_v33  ;;  %v391_v47 = vor.u32 %v389_v36, %v387_v28 }
  0x4d   :  { %v314_v46 = vxor.u32 %v312_v31, %v310_v22  ;;  %v273_v48 = vmul.u32 2246822507, %v271_v37  ;;  %v353_v50 = vadd.s32 3864292196, %v351_v39  ;;  %v390_v57 = vshrl.u32 %v386_v24, 19 }
  0x4e   :  { %v315_v49 = vmul.u32 2246822507, %v313_v38  ;;  %v276_v42 = vxor.u32 %v274_v45, %v272_v29  ;;  %v354_v52 = vshrl.u32 %v352_v32, 16  ;;  %v393_v53 = vmul.u32 5, %v391_v47 }
  0x4f   :  { %v316_v51 = vmul.u32 2246822507, %v314_v46  ;;  %v275_v54 = vshrl.u32 %v273_v48, 13  ;;  %v355_v56 = vshrl.u32 %v353_v50, 16  ;;  %v392_v63 = vor.u32 %v390_v57, %v388_v40 }
  0x50   :  { %v317_v55 = vshrl.u32 %v315_v49, 13  ;;  %v278_v58 = vmul.u32 3266489909, %v276_v42  ;;  %v356_v59 = vxor.u32 %v354_v52, %v352_v32  ;;  %v395_v34 = vadd.s32 3864292196, %v393_v53 }
  0x51   :  { %v318_v43 = vshrl.u32 %v316_v51, 13  ;;  %v277_v60 = vxor.u32 %v275_v54, %v273_v48  ;;  %v357_v62 = vxor.u32 %v355_v56, %v353_v50  ;;  %v394_v13 = vmul.u32 5, %v392_v63 }
  0x52   :  { %v319_v61 = vxor.u32 %v317_v55, %v315_v49  ;;  %v280_v0 = vshrl.u32 %v278_v58, 16  ;;  %v358_v1 = vmul.u32 2246822507, %v356_v59  ;;  %v397_v2 = vshrl.u32 %v395_v34, 16 }
  0x53   :  { %v320_v44 = vxor.u32 %v318_v43, %v316_v51  ;;  %v279_v3 = vmul.u32 3266489909, %v277_v60  ;;  %v359_v5 = vmul.u32 2246822507, %v357_v62  ;;  %v396_v21 = vadd.s32 3864292196, %v394_v13 }
  0x54   :  { %v321_v4 = vmul.u32 3266489909, %v319_v61  ;;  %v282_v6 = vxor.u32 %v280_v0, %v278_v58  ;;  %v360_v8 = vshrl.u32 %v358_v1, 13  ;;  %v399_v9 = vxor.u32 %v397_v2, %v395_v34 }
  0x55   :  { %v322_v7 = vmul.u32 3266489909, %v320_v44  ;;  %v281_v10 = vshrl.u32 %v279_v3, 16  ;;  %v361_v12 = vshrl.u32 %v359_v5, 13  ;;  %v398_v36 = vshrl.u32 %v396_v21, 16 }
  0x56   :  { %v323_v11 = vshrl.u32 %v321_v4, 16  ;;  %v284_v14 = vshrl.u32 %v282_v6, 8  ;;  %v362_v16 = vxor.u32 %v360_v8, %v358_v1  ;;  %v401_v17 = vmul.u32 2246822507, %v399_v9 }
  0x57   :  { %v324_v15 = vshrl.u32 %v322_v7, 16  ;;  %v283_v18 = vxor.u32 %v281_v10, %v279_v3  ;;  %v363_v20 = vxor.u32 %v361_v12, %v359_v5  ;;  %v400_v47 = vxor.u32 %v398_v36, %v396_v21 }
  0x58   :  { %v325_v19 = vxor.u32 %v323_v11, %v321_v4  ;;  %vm286_vm10 = vcmp.lt.s32.totalorder %v284_v14, %v600_v35  ;;  %v364_v23 = vmul.u32 3266489909, %v362_v16  ;;  %v403_v24 = vshrl.u32 %v401_v17, 13 }
  0x59   :  { %v326_v22 = vxor.u32 %v324_v15, %v322_v7  ;;  %v453_v25 = vsel %vm286_vm10, 1.0, %v547_v30  ;;  %v285_v26 = vshrl.u32 %v283_v18, 8  ;;  %v365_v28 = vmul.u32 3266489909, %v363_v20 }
  0x5a   :  { %v327_v27 = vshrl.u32 %v325_v19, 8  ;;  %293 = vst [vmem:[#allocation8 + $0x40] sm:$0xff] %v453_v25  ;;  %v366_v31 = vshrl.u32 %v364_v23, 16  ;;  %v405_v33 = vxor.u32 %v403_v24, %v401_v17  ;;  %v402_v42 = vmul.u32 2246822507, %v400_v47 }
  0x5b   :  { %v328_v29 = vshrl.u32 %v326_v22, 8  ;;  %vm287_vm11 = vcmp.lt.s32.totalorder %v285_v26, %v606_v41  ;;  %v367_v37 = vshrl.u32 %v365_v28, 16 }
  0x5c   :  { %vm329_vm12 = vcmp.lt.s32.totalorder %v327_v27, %v600_v35  ;;  %v454_v38 = vsel %vm287_vm11, 1.0, %v547_v30  ;;  %v368_v40 = vxor.u32 %v366_v31, %v364_v23  ;;  %v407_v32 = vmul.u32 3266489909, %v405_v33 }
  0x5d   :  { %v455_v39 = vsel %vm329_vm12, 1.0, %v547_v30  ;;  %vm330_vm13 = vcmp.lt.s32.totalorder %v328_v29, %v606_v41  ;;  %294 = vst [vmem:[#allocation8 + $0x48] sm:$0xff] %v454_v38  ;;  %v369_v46 = vxor.u32 %v367_v37, %v365_v28  ;;  %v404_v53 = vshrl.u32 %v402_v42, 13 }
  0x5e   :  { %v456_v45 = vsel %vm330_vm13, 1.0, %v547_v30  ;;  %336 = vst [vmem:[#allocation8 + $0x50] sm:$0xff] %v455_v39  ;;  %v370_v48 = vshrl.u32 %v368_v40, 8  ;;  %v409_v50 = vshrl.u32 %v407_v32, 16 }
  0x5f   :  { %337 = vst [vmem:[#allocation8 + $0x58] sm:$0xff] %v456_v45  ;;  %v371_v49 = vshrl.u32 %v369_v46, 8  ;;  %v406_v56 = vxor.u32 %v404_v53, %v402_v42 }
  0x60   :  { %vm372_vm14 = vcmp.lt.s32.totalorder %v370_v48, %v600_v35  ;;  %v411_v52 = vxor.u32 %v409_v50, %v407_v32 }
  0x61   :  { %v457_v51 = vsel %vm372_vm14, 1.0, %v547_v30  ;;  %vm373_vm15 = vcmp.lt.s32.totalorder %v371_v49, %v606_v41  ;;  %v408_v57 = vmul.u32 3266489909, %v406_v56 }
  0x62   :  { %379 = vst [vmem:[#allocation8 + $0x60] sm:$0xff] %v457_v51  ;;  %v458_v54 = vsel %vm373_vm15, 1.0, %v547_v30  ;;  %v413_v55 = vshrl.u32 %v411_v52, 8 }
  0x63   :  { %380 = vst [vmem:[#allocation8 + $0x68] sm:$0xff] %v458_v54  ;;  %v410_v43 = vshrl.u32 %v408_v57, 16 }
  0x64   :  { %vm415_vm0 = vcmp.lt.s32.totalorder %v413_v55, %v600_v35 }
  0x65   :  { %v459_v58 = vsel %vm415_vm0, 1.0, %v547_v30  ;;  %v412_v59 = vxor.u32 %v410_v43, %v408_v57 }
  0x66   :  { %422 = vst [vmem:[#allocation8 + $0x70] sm:$0xff] %v459_v58 }
  0x67   :  { %v414_v34 = vshrl.u32 %v412_v59, 8 }
  0x69   :  { %vm416_vm1 = vcmp.lt.s32.totalorder %v414_v34, %v606_v41 }
  0x6a   :  { %v460_v60 = vsel %vm416_vm1, 1.0, %v547_v30 }
  0x6b   :  { %423 = vst [vmem:[#allocation8 + $0x78] sm:$0xff] %v460_v60 }
  0x6c   :  { %436 = dma.vmem_to_hbm [thread:$0]  %s429_s19, 2048, %s431_s2, [#allocation5], %s545_s21, %s545_s21, %s546_s22  }
  0x6d   :  { %541 = dma.done.wait [#allocation5], 2048  }
  0x6e   :  { %542 = vsyncadd [#allocation5], 4294965248 }
  0x6f   :  { %441 = vsyncpa [#allocation4], 1 }
  0x70   :  { %442 = vsyncpa [#allocation5], 1 }
  0x71   :  { %443 = vsyncpa [#allocation6], 1 }

</bundles_post_ra>
